<compile_context>
chip_gen: v7x
topology: tpu7x:2x2x1
jax: 0.10.0
libtpu: 0.0.40
codegen_flags: <defaults>
</compile_context>

<pallas_src>
import functools

import jax
import jax.numpy as jnp
from jax.experimental import pallas as pl
from jax.experimental.pallas import tpu as pltpu

_LANES = 512        # lane-dense slab width (multiple of 128 -> unmasked stores)
_ROW_ALIGN = 32     # row-tile granularity (covers f32/bf16/int8 sublane packing)
_TILE_ROWS = 1024   # 1024 x 512 x 4 B = 2 MiB per f32 input tile
_NUM_CORES = 2      # megacore split for the reduction path (no-op on 1-TC chips)
_VMEM_LIMIT = 32 * 1024 * 1024


def _bce_loss_tile(x, z):
    # Numerically-stable BCE-with-logits, identical to
    # torch.nn.functional.binary_cross_entropy_with_logits(reduction='none'):
    #   loss = max(x, 0) - x*z + log(1 + exp(-|x|))
    return jnp.maximum(x, 0.0) - x * z + jnp.log1p(jnp.exp(-jnp.abs(x)))


def _bce_reduce_kernel(x_ref, z_ref, out_ref, acc_ref, *, n, tr, tiles_per_core):
    c = pl.program_id(0)            # core split (parallel)
    i = pl.program_id(1)            # row tiles (arbitrary, carried accumulator)
    last_i = pl.num_programs(1) - 1
    tile_idx = c * tiles_per_core + i          # global tile index (unclamped)

    @pl.when(i == 0)
    def _():
        acc_ref[...] = jnp.zeros_like(acc_ref)

    x = x_ref[...].astype(jnp.float32)
    z = z_ref[...].astype(jnp.float32)
    loss = _bce_loss_tile(x, z)

    tile_elems = tr * _LANES
    fully_valid = (tile_idx + 1) * tile_elems <= n

    @pl.when(fully_valid)
    def _():
        # Interior tiles: unmasked, vreg-aligned partial sum (pure VPU adds).
        acc_ref[...] += loss.reshape(tr // 8, 8, _LANES).sum(axis=0)

    @pl.when(jnp.logical_not(fully_valid))
    def _():
        # Only tiles that overhang N (ragged tail / grid overhang) are masked.
        row_i = jax.lax.broadcasted_iota(jnp.int32, loss.shape, 0) + tile_idx * tr
        lane_i = jax.lax.broadcasted_iota(jnp.int32, loss.shape, 1)
        mask = (row_i * _LANES + lane_i) < n
        masked = jnp.where(mask, loss, 0.0)
        acc_ref[...] += masked.reshape(tr // 8, 8, _LANES).sum(axis=0)

    @pl.when(i == last_i)
    def _():
        # Single small (8 x 512) cross-lane reduce per core in the epilogue.
        partial = jnp.sum(acc_ref[...])
        out_ref[...] = jnp.full((1, 8, 128), partial, jnp.float32)


def _bce_elementwise_kernel(x_ref, z_ref, out_ref):
    x = x_ref[...].astype(jnp.float32)
    z = z_ref[...].astype(jnp.float32)
    out_ref[...] = _bce_loss_tile(x, z).astype(out_ref.dtype)


def ce_loss(score, label, reduction="mean", tile_rows=_TILE_ROWS):
    """JAX/Pallas equivalent of CELoss.forward(score, label)."""
    n = score.size
    assert label.size == n, "score and label must have the same element count"
    assert tile_rows % _ROW_ALIGN == 0 and tile_rows >= _ROW_ALIGN

    if n == 0:  # match torch edge-case semantics
        if reduction == "mean":
            return jnp.float32(jnp.nan)
        if reduction == "sum":
            return jnp.float32(0.0)
        return jnp.zeros((0, 1), score.dtype)

    x = score.reshape(-1)
    z = label.reshape(-1)

    rows = max(_ROW_ALIGN, pl.cdiv(n, _LANES))
    total = rows * _LANES
    if total != n:
        # One-time pad only for non-lane-divisible N; padded / OOB elements
        # are masked inside the reduce kernel and sliced off for 'none'.
        x = jnp.pad(x, (0, total - n))
        z = jnp.pad(z, (0, total - n))
    x = x.reshape(rows, _LANES)
    z = z.reshape(rows, _LANES)

    # Tile height: a multiple of _ROW_ALIGN, never taller than the slab.
    if rows >= tile_rows:
        tr = tile_rows
    else:
        tr = max(_ROW_ALIGN, (rows // _ROW_ALIGN) * _ROW_ALIGN)
    tiles = pl.cdiv(rows, tr)

    if reduction in ("mean", "sum"):
        tpc = pl.cdiv(tiles, _NUM_CORES)

        def in_map(c, i):
            # Clamp: overhang grid steps re-read the last tile but contribute
            # zero (their global offsets are >= n, so the mask kills them).
            return (jnp.minimum(c * tpc + i, tiles - 1), 0)

        kernel = functools.partial(
            _bce_reduce_kernel, n=n, tr=tr, tiles_per_core=tpc
        )
        partials = pl.pallas_call(
            kernel,
            grid=(_NUM_CORES, tpc),
            in_specs=[
                pl.BlockSpec((tr, _LANES), in_map),
                pl.BlockSpec((tr, _LANES), in_map),
            ],
            out_specs=pl.BlockSpec((1, 8, 128), lambda c, i: (c, 0, 0)),
            out_shape=jax.ShapeDtypeStruct((_NUM_CORES, 8, 128), jnp.float32),
            scratch_shapes=[pltpu.VMEM((8, _LANES), jnp.float32)],
            compiler_params=pltpu.CompilerParams(
                dimension_semantics=("parallel", "arbitrary"),
                vmem_limit_bytes=_VMEM_LIMIT,
            ),
        )(x, z)
        total_loss = jnp.sum(partials[:, 0, 0])
        if reduction == "mean":
            total_loss = total_loss / jnp.float32(n)
        return total_loss

    # reduction == 'none': elementwise, megacore-parallel over row tiles,
    # unmasked full-vreg stores in the input dtype.
    out = pl.pallas_call(
        _bce_elementwise_kernel,
        grid=(tiles,),
        in_specs=[
            pl.BlockSpec((tr, _LANES), lambda i: (i, 0)),
            pl.BlockSpec((tr, _LANES), lambda i: (i, 0)),
        ],
        out_specs=pl.BlockSpec((tr, _LANES), lambda i: (i, 0)),
        out_shape=jax.ShapeDtypeStruct((rows, _LANES), score.dtype),
        compiler_params=pltpu.CompilerParams(
            dimension_semantics=("parallel",),
            vmem_limit_bytes=_VMEM_LIMIT,
        ),
    )(x, z)
    # Un-pad and restore the (N, 1) elementwise shape of the torch module.
    return out.reshape(-1)[:n].reshape(-1, 1)


def _ce_loss_ref(score, label, reduction="mean"):
    x = score.astype(jnp.float32)
    z = label.reshape(-1, 1).astype(jnp.float32)
    loss = jnp.maximum(x, 0.0) - x * z + jnp.log1p(jnp.exp(-jnp.abs(x)))
    if reduction == "mean":
        return loss.mean()
    elif reduction == "sum":
        return loss.sum()
    return loss


if __name__ == "__main__":
    key = jax.random.PRNGKey(0)
    ks = jax.random.split(key, 6)
    ok = True

    # Case 1: small batch of logits, shape (N, 1), labels shape (N,).
    N = 256
    score = jax.random.normal(ks[0], (N, 1), dtype=jnp.float32)
    label = jax.random.bernoulli(ks[1], 0.5, (N,)).astype(jnp.float32)
    for reduction in ("mean", "sum", "none"):
        out = jax.block_until_ready(ce_loss(score, label, reduction=reduction))
        ref = _ce_loss_ref(score, label, reduction=reduction)
        if not jnp.allclose(out, ref, rtol=1e-5, atol=1e-5):
            ok = False

    # Case 2: ragged size + small tile -> multi-tile grid, megacore split,
    # carried accumulator, partial last block and tail masking.
    N2 = 40000
    score2 = jax.random.normal(ks[2], (N2, 1), dtype=jnp.float32)
    label2 = jax.random.bernoulli(ks[3], 0.5, (N2,)).astype(jnp.float32)
    for reduction in ("mean", "sum", "none"):
        out = jax.block_until_ready(
            ce_loss(score2, label2, reduction=reduction, tile_rows=_ROW_ALIGN)
        )
        ref = _ce_loss_ref(score2, label2, reduction=reduction)
        if not jnp.allclose(out, ref, rtol=1e-5, atol=1e-5):
            ok = False

    # Case 3: bf16 score/label — per-tile cast path and narrow 'none' output.
    N3 = 5000
    score3 = jax.random.normal(ks[4], (N3, 1), dtype=jnp.bfloat16)
    label3 = jax.random.bernoulli(ks[5], 0.5, (N3,)).astype(jnp.bfloat16)
    for reduction in ("mean", "sum"):
        out = jax.block_until_ready(ce_loss(score3, label3, reduction=reduction))
        ref = _ce_loss_ref(score3, label3, reduction=reduction)
        if not jnp.allclose(out, ref, rtol=1e-5, atol=1e-5):
            ok = False
    out3 = jax.block_until_ready(ce_loss(score3, label3, reduction="none"))
    ref3 = _ce_loss_ref(score3, label3, reduction="none")
    if not jnp.allclose(out3.astype(jnp.float32), ref3, rtol=1e-2, atol=1e-2):
        ok = False

    if ok:
        print("KERNEL_OK")
</pallas_src>

<mosaic_0001>
module attributes {stable_mosaic.version = 11 : i64} {
  func.func @_bce_reduce_kernel(%arg0: i32, %arg1: i32, %arg2: memref<32x512xf32, #tpu.memory_space<vmem>>, %arg3: memref<32x512xf32, #tpu.memory_space<vmem>>, %arg4: memref<1x8x128xf32, #tpu.memory_space<vmem>>, %arg5: memref<8x512xf32, #tpu.memory_space<vmem>>) attributes {dimension_semantics = [#tpu.dimension_semantics<parallel>, #tpu.dimension_semantics<arbitrary>], iteration_bounds = array<i64: 2, 1>, scalar_prefetch = 0 : i64, scratch_operands = 1 : i64, tpu.core_type = #tpu.core_type<tc>, window_params = [{transform_indices = @transform_0, window_bounds = array<i64: 32, 512>}, {transform_indices = @transform_1, window_bounds = array<i64: 32, 512>}, {transform_indices = @transform_2, window_bounds = array<i64: 1, 8, 128>}]} {
    %c1_i32 = arith.constant 1 : i32
    %0 = arith.muli %arg0, %c1_i32 : i32
    %1 = arith.addi %0, %arg1 : i32
    %c0_i32 = arith.constant 0 : i32
    %2 = arith.cmpi eq, %arg1, %c0_i32 : i32
    %3 = arith.extui %2 : i1 to i32
    %c0_i32_0 = arith.constant 0 : i32
    %4 = arith.cmpi ne, %3, %c0_i32_0 : i32
    scf.if %4 {
      %cst_10 = arith.constant 0.000000e+00 : f32
      %28 = vector.broadcast %cst_10 : f32 to vector<8x512xf32>
      %c0_11 = arith.constant 0 : index
      %c0_12 = arith.constant 0 : index
      %29 = vector.load %arg5[%c0_11, %c0_12] : memref<8x512xf32, #tpu.memory_space<vmem>>, vector<8x512xf32>
      tpu.vector_store %arg5[%c0_11, %c0_12], %28 {strides = array<i32>} : memref<8x512xf32, #tpu.memory_space<vmem>>, vector<8x512xf32>,
    } else {
    }
    %c0 = arith.constant 0 : index
    %c0_1 = arith.constant 0 : index
    %5 = vector.load %arg2[%c0, %c0_1] : memref<32x512xf32, #tpu.memory_space<vmem>>, vector<32x512xf32>
    %c0_2 = arith.constant 0 : index
    %c0_3 = arith.constant 0 : index
    %6 = vector.load %arg3[%c0_2, %c0_3] : memref<32x512xf32, #tpu.memory_space<vmem>>, vector<32x512xf32>
    %cst = arith.constant 0.000000e+00 : f32
    %7 = vector.broadcast %cst : f32 to vector<32x512xf32>
    %8 = arith.maximumf %5, %7 : vector<32x512xf32>
    %9 = arith.mulf %5, %6 : vector<32x512xf32>
    %10 = arith.subf %8, %9 : vector<32x512xf32>
    %11 = math.absf %5 : vector<32x512xf32>
    %cst_4 = arith.constant 0.000000e+00 : f32
    %12 = vector.broadcast %cst_4 : f32 to vector<32x512xf32>
    %13 = arith.subf %12, %11 : vector<32x512xf32>
    %14 = math.exp %13 : vector<32x512xf32>
    %15 = math.log1p %14 : vector<32x512xf32>
    %16 = arith.addf %10, %15 : vector<32x512xf32>
    %c1_i32_5 = arith.constant 1 : i32
    %17 = arith.addi %1, %c1_i32_5 : i32
    %c16384_i32 = arith.constant 16384 : i32
    %18 = arith.muli %17, %c16384_i32 : i32
    %c256_i32 = arith.constant 256 : i32
    %19 = arith.cmpi sle, %18, %c256_i32 : i32
    %20 = arith.extui %19 : i1 to i32
    %c0_i32_6 = arith.constant 0 : i32
    %21 = arith.cmpi ne, %20, %c0_i32_6 : i32
    scf.if %21 {
      %c0_10 = arith.constant 0 : index
      %c0_11 = arith.constant 0 : index
      %28 = vector.load %arg5[%c0_10, %c0_11] : memref<8x512xf32, #tpu.memory_space<vmem>>, vector<8x512xf32>
      %29 = vector.shape_cast %16 : vector<32x512xf32> to vector<4x8x512xf32>
      %cst_12 = arith.constant dense<0.000000e+00> : vector<8x512xf32>
      %30 = vector.multi_reduction <add>, %29, %cst_12 [0] : vector<4x8x512xf32> to vector<8x512xf32>
      %31 = arith.addf %28, %30 : vector<8x512xf32>
      %c0_13 = arith.constant 0 : index
      %c0_14 = arith.constant 0 : index
      %32 = vector.load %arg5[%c0_13, %c0_14] : memref<8x512xf32, #tpu.memory_space<vmem>>, vector<8x512xf32>
      tpu.vector_store %arg5[%c0_13, %c0_14], %31 {strides = array<i32>} : memref<8x512xf32, #tpu.memory_space<vmem>>, vector<8x512xf32>,
    } else {
    }
    %true = arith.constant true
    %22 = arith.xori %19, %true : i1
    %23 = arith.extui %22 : i1 to i32
    %c0_i32_7 = arith.constant 0 : i32
    %24 = arith.cmpi ne, %23, %c0_i32_7 : i32
    scf.if %24 {
      %28 = tpu.iota {dimensions = array<i32: 0>} : vector<32x512xi32>
      %c32_i32 = arith.constant 32 : i32
      %29 = arith.muli %1, %c32_i32 : i32
      %30 = vector.broadcast %29 : i32 to vector<32x512xi32>
      %31 = arith.addi %28, %30 : vector<32x512xi32>
      %32 = tpu.iota {dimensions = array<i32: 1>} : vector<32x512xi32>
      %c512_i32 = arith.constant 512 : i32
      %33 = vector.broadcast %c512_i32 : i32 to vector<32x512xi32>
      %34 = arith.muli %31, %33 : vector<32x512xi32>
      %35 = arith.addi %34, %32 : vector<32x512xi32>
      %c256_i32_10 = arith.constant 256 : i32
      %36 = vector.broadcast %c256_i32_10 : i32 to vector<32x512xi32>
      %37 = arith.cmpi slt, %35, %36 : vector<32x512xi32>
      %cst_11 = arith.constant 0.000000e+00 : f32
      %38 = vector.broadcast %cst_11 : f32 to vector<32x512xf32>
      %39 = arith.select %37, %16, %38 : vector<32x512xi1>, vector<32x512xf32>
      %c0_12 = arith.constant 0 : index
      %c0_13 = arith.constant 0 : index
      %40 = vector.load %arg5[%c0_12, %c0_13] : memref<8x512xf32, #tpu.memory_space<vmem>>, vector<8x512xf32>
      %41 = vector.shape_cast %39 : vector<32x512xf32> to vector<4x8x512xf32>
      %cst_14 = arith.constant dense<0.000000e+00> : vector<8x512xf32>
      %42 = vector.multi_reduction <add>, %41, %cst_14 [0] : vector<4x8x512xf32> to vector<8x512xf32>
      %43 = arith.addf %40, %42 : vector<8x512xf32>
      %c0_15 = arith.constant 0 : index
      %c0_16 = arith.constant 0 : index
      %44 = vector.load %arg5[%c0_15, %c0_16] : memref<8x512xf32, #tpu.memory_space<vmem>>, vector<8x512xf32>
      tpu.vector_store %arg5[%c0_15, %c0_16], %43 {strides = array<i32>} : memref<8x512xf32, #tpu.memory_space<vmem>>, vector<8x512xf32>,
    } else {
    }
    %c0_i32_8 = arith.constant 0 : i32
    %25 = arith.cmpi eq, %arg1, %c0_i32_8 : i32
    %26 = arith.extui %25 : i1 to i32
    %c0_i32_9 = arith.constant 0 : i32
    %27 = arith.cmpi ne, %26, %c0_i32_9 : i32
    scf.if %27 {
      %c0_10 = arith.constant 0 : index
      %c0_11 = arith.constant 0 : index
      %28 = vector.load %arg5[%c0_10, %c0_11] : memref<8x512xf32, #tpu.memory_space<vmem>>, vector<8x512xf32>
      %29 = vector.shape_cast %28 : vector<8x512xf32> to vector<1x8x512xf32>
      %cst_12 = arith.constant dense<0.000000e+00> : vector<1xf32>
      %30 = vector.multi_reduction <add>, %29, %cst_12 [1, 2] : vector<1x8x512xf32> to vector<1xf32>
      %31 = vector.shape_cast %30 : vector<1xf32> to vector<1x1x1xf32>
      %32 = vector.extract %31[0, 0, 0] : f32 from vector<1x1x1xf32>
      %33 = vector.broadcast %32 : f32 to vector<1x8x128xf32>
      %c0_13 = arith.constant 0 : index
      %c0_14 = arith.constant 0 : index
      %c0_15 = arith.constant 0 : index
      %34 = vector.load %arg4[%c0_13, %c0_14, %c0_15] : memref<1x8x128xf32, #tpu.memory_space<vmem>>, vector<1x8x128xf32>
      tpu.vector_store %arg4[%c0_13, %c0_14, %c0_15], %33 {strides = array<i32>} : memref<1x8x128xf32, #tpu.memory_space<vmem>>, vector<1x8x128xf32>,
    } else {
    }
    return
  }
  func.func @transform_0(%arg0: i32, %arg1: i32) -> (i32, i32) {
    %c1_i32 = arith.constant 1 : i32
    %0 = arith.muli %arg0, %c1_i32 : i32
    %1 = arith.addi %0, %arg1 : i32
    %c0_i32 = arith.constant 0 : i32
    %2 = arith.minsi %1, %c0_i32 : i32
    %c0_i32_0 = arith.constant 0 : i32
    %c0_i32_1 = arith.constant 0 : i32
    return %2, %c0_i32_0 : i32, i32
  }
  func.func @transform_1(%arg0: i32, %arg1: i32) -> (i32, i32) {
    %c1_i32 = arith.constant 1 : i32
    %0 = arith.muli %arg0, %c1_i32 : i32
    %1 = arith.addi %0, %arg1 : i32
    %c0_i32 = arith.constant 0 : i32
    %2 = arith.minsi %1, %c0_i32 : i32
    %c0_i32_0 = arith.constant 0 : i32
    %c0_i32_1 = arith.constant 0 : i32
    return %2, %c0_i32_0 : i32, i32
  }
  func.func @transform_2(%arg0: i32, %arg1: i32) -> (i32, i32, i32) {
    %c0_i32 = arith.constant 0 : i32
    %c0_i32_0 = arith.constant 0 : i32
    %c0_i32_1 = arith.constant 0 : i32
    return %arg0, %c0_i32, %c0_i32_0 : i32, i32, i32
  }
}

</mosaic_0001>

<bundles_post_ra>
// kernel: tpu_custom_call.1
= control target key start
LH: loop header
LB: loop body
LE: loop exit
PB: predicated region body
PF: predicated region fallthrough
CT: control target
= control target key end

     0   :  { %7 = vsyncpa [#allocation4], 0  ;;  %s1900_s0 = inlined_call_operand.hbm [shape: f32[32,512], index: 0, kind: input, shape index: {}]   ;;  %s1901_s1 = inlined_call_operand.hbm [shape: f32[32,512], index: 1, kind: input, shape index: {}]   ;;  %s1902_s2 = inlined_call_operand.hbm [shape: f32[2,8,128], index: 2, kind: output, shape index: {}]  }
   0x1   :  { %9 = vsyncpa [#allocation4 + $0x1], 0 }
   0x2   :  { %10 = vsyncpa [#allocation7], 0 }
   0x3   :  { %12 = vsyncpa [#allocation7 + $0x1], 0 }
   0x4   :  { %13 = vsyncpa [#allocation5], 0 }
   0x5   :  { %15 = vsyncpa [#allocation5 + $0x1], 0  ;;  %s1197_s9 = smov 0   ;;  %s1199_s10 = smov 0  }
   0x6   :  { %s1201_s11 = smov 0   ;;  %s1203_s12 = smov 0  }
   0x7   :  { %s1205_s13 = smov 0   ;;  %s1207_s14 = smov 0  }
   0x8   :  { %s1209_s15 = smov 0   ;;  %s1211_s16 = smov 0  }
   0x9 LB: > { %s817_s17 = sadd.s32 4294967295, %s1174_s16   ;;  %s818_s18 = sadd.s32 4294967294, %s1174_s16   ;;  %s1174_s16 = sphi %s1211_s16, %s21_s16   ;;  %s1170_s15 = sphi %s1209_s15, %s1952_s15   ;;  %s1166_s14 = sphi %s1207_s14, %s1951_s14   ;;  %s1162_s13 = sphi %s1205_s13, %s1890_s13   ;;  %s1158_s12 = sphi %s1203_s12, %s1950_s12   ;;  %s1154_s11 = sphi %s1201_s11, %s1949_s11   ;;  %s1150_s10 = sphi %s1199_s10, %s1948_s10   ;;  %s1146_s9 = sphi %s1197_s9, %s1947_s9  }
   0xa   : > { %s33_s19 = sadd.s32 1, %s1170_s15  ;;  %p1143_p1 = scmp.ne.s32.totalorder %s1162_s13, 0 }
   0xb   : > { %p35_p0 = scmp.ge.s32.totalorder %s33_s19, 2  ;;  %p54_p2 = scmp.eq.s32.totalorder %s1174_s16, 0 }
   0xc   : > { %p59_p3 = scmp.ne.s32.totalorder %s1162_s13, %s1158_s12  ;;  %p60_p5 = scmp.eq.s32.totalorder %s817_s17, 0 }
   0xd   : > { %s1954_s19 = smov (%p35_p0, %s33_s19), 0  ;;  %p1243_p4 = por %p1143_p1, %p54_p2 }
   0xe   : > { %p1247_p6 = por %p60_p5, %p59_p3  ;;  %s101_s22 = ssub.s32 %s1170_s15, %s1954_s19 }
   0xf   : > { %p102_p7 = scmp.eq.s32.totalorder %s101_s22, 0  ;;  %s104_s23 = sadd.s32 1, %s1154_s11 }
  0x10   : > { %s1906_s21 = scalar_select %p1247_p6, 1, 0 }
  0x11   : > { %s1255_s24 = scalar_select %p102_p7, %s1154_s11, %s104_s23  }
  0x12   : > { %p114_p8 = scmp.ne.s32.totalorder %s1154_s11, %s1150_s10  ;;  %p115_p9 = scmp.eq.s32.totalorder %s817_s17, 1 }
  0x13   : > { %p120_p10 = scmp.ne.s32.totalorder %s1150_s10, %s1146_s9  ;;  %p121_p11 = scmp.eq.s32.totalorder %s818_s18, 1 }
  0x14   : > { %p1261_p12 = por %p115_p9, %p114_p8  ;;  %p866_p1 = scmp.lt.s32.totalorder %s1174_s16, 2 }
  0x15   : > { %p1266_p0 = por %p121_p11, %p120_p10  ;;  %s1176_s27 = smov [#allocation3]  }
  0x16   : > { %s1907_s25 = scalar_select %p1261_p12, 1, 0 }
  0x17   : > { %s1908_s26 = scalar_select %p1266_p0, 1, 0 }
  0x18   : > { %s156_s28 = sshll.u32 %s1176_s27, 4  ;;  %p1273_p2 = pnand %p866_p1, %p1243_p4  ;;  %s157_s28 = int_to_ptr.vmem [resolvable:$true] %s156_s28 }
  0x19   : > { %s1007_s4 = scalar_lea.hbm %s1900_s0, 2048 }
  0x1a   : > { %p1008_p3 = scmp.ne.s32.totalorder %s1900_s0, %s1007_s4  ;;  %p1009_p5 = pneg %p1273_p2 }
  0x1b   : > { %p1014_p8 = scmp.lt.u32.totalorder %s1007_s4, %s1007_s4  ;;  %p1016_p9 = scmp.lt.u32.totalorder %s1007_s4, %s1900_s0 }
  0x1c   : > { %p1010_p7 = pnand %p1009_p5, %p1008_p3 }
  0x1d   : > { %p1017_p10 = por %p1016_p9, %p1014_p8 }
  0x1e   : > { %p1011_p4 = pneg %p1010_p7 }
  0x20   : > { %p1018_p11 = pnand %p1017_p10, %p1011_p4 }
  0x22   : > { %1021 = shalt.err (!%p1018_p11)
}
  0x23   : > { %s1022_s12 = scalar_lea.vmem %s157_s28, 2048  ;;  %s1029_s17 = scalar_lea.vmem %s157_s28, 4096 }
  0x24   : > { %p1023_p1 = scmp.ne.s32.totalorder %s157_s28, %s1022_s12  ;;  %p1030_p12 = scmp.lt.s32.totalorder %s157_s28, %s157_s28 }
  0x25   : > { %p1031_p6 = scmp.lt.s32.totalorder %s1029_s17, %s1022_s12 }
  0x26   : > { %p1025_p13 = pnand %p1023_p1, %p1009_p5 }
  0x27   : > { %p1032_p3 = por %p1031_p6, %p1030_p12 }
  0x28   : > { %p1026_p0 = pneg %p1025_p13 }
  0x2a   : > { %p1033_p7 = pnand %p1032_p3, %p1026_p0 }
  0x2c   : > { %1036 = shalt.err (!%p1033_p7)
}
  0x2d   : > { %s1177_s18 = smov 512   ;;  %s1178_s20 = smov 32  }
  0x2e   : > { %858 = dma.hbm_to_vmem [thread:$0]  (!%p1273_p2), %s1900_s0, 2048, %s157_s28, [#allocation4], %s1177_s18, %s1177_s18, %s1178_s20  }
  0x2f   : > { %p829_p13 = scmp.ge.s32.totalorder %s1174_s16, 1  ;;  %p189_p4 = scmp.lt.s32.totalorder %s1174_s16, 3 }
  0x30   : > { %s1179_s30 = smov [#allocation6]   ;;  %s1037_s6 = scalar_lea.hbm %s1901_s1, 2048 }
  0x31   : > { %p1304_p8 = pnand %p829_p13, %p189_p4  ;;  %s181_s3 = sshll.u32 %s1179_s30, 4  ;;  %s182_s3 = int_to_ptr.vmem [resolvable:$true] %s181_s3 }
  0x32   : > { %p1038_p6 = scmp.ne.s32.totalorder %s1901_s1, %s1037_s6  ;;  %p1044_p9 = scmp.lt.u32.totalorder %s1037_s6, %s1037_s6 }
  0x33   : > { %s1910_s27 = scalar_select %p1304_p8, 1, 0 }
  0x34   : > { %p1040_p12 = pnand %p1038_p6, %p1009_p5  ;;  %p1046_p10 = scmp.lt.u32.totalorder %s1037_s6, %s1901_s1 }
  0x36   : > { %p1041_p0 = pneg %p1040_p12  ;;  %p1047_p11 = por %p1046_p10, %p1044_p9 }
  0x38   : > { %p1048_p1 = pnand %p1047_p11, %p1041_p0 }
  0x3a   : > { %1051 = shalt.err (!%p1048_p1)
}
  0x3b   : > { %s1052_s17 = scalar_lea.vmem %s182_s3, 2048  ;;  %s1059_s22 = scalar_lea.vmem %s182_s3, 4096 }
  0x3c   : > { %p1053_p3 = scmp.ne.s32.totalorder %s182_s3, %s1052_s17  ;;  %p1060_p4 = scmp.lt.s32.totalorder %s182_s3, %s182_s3 }
  0x3d   : > { %p1061_p8 = scmp.lt.s32.totalorder %s1059_s22, %s1052_s17 }
  0x3e   : > { %p1055_p7 = pnand %p1053_p3, %p1009_p5 }
  0x3f   : > { %p1062_p6 = por %p1061_p8, %p1060_p4 }
  0x40   : > { %p1056_p13 = pneg %p1055_p7 }
  0x42   : > { %p1063_p12 = pnand %p1062_p6, %p1056_p13 }
  0x44   : > { %1066 = shalt.err (!%p1063_p12)
}
  0x45   : > { %861 = dma.hbm_to_vmem [thread:$0]  (!%p1273_p2), %s1901_s1, 2048, %s182_s3, [#allocation7], %s1177_s18, %s1177_s18, %s1178_s20  }
  0x46   : > { %p1911_p0 = scmp.ne.s32.totalorder %s1910_s27, 0 }
  0x47   : > { %s195_s4 = sand.u32 (!%p1911_p0), 1, %s1162_s13   ;;  %p1912_p5 = scmp.ne.s32.totalorder (!%p1911_p0), %s1906_s21, 0 }
  0x48   : > { %193 = sbr.rel (%p1911_p0) target bundleno = 425 (0x1a9), region = 28  ;;  %s830_s5 = sshll.u32 (!%p1911_p0), %s195_s4, 7 }
  0x49   : > { %s196_s6 = scalar_lea.sflag (!%p1911_p0), [#allocation4], %s195_s4  ;;  %s1334_s7 = scalar_lea.vmem (!%p1911_p0), [#allocation3], %s830_s5 }
  0x4f   : > { %1132 = dma.done.wait (%p1912_p5), %s196_s6, 2048  }
  0x50   : > { %1134 = vsyncadd (%p1912_p5), %s196_s6, 4294965248  ;;  %s205_s29 = scalar_lea.sflag [#allocation7], %s195_s4  ;;  %s1340_s8 = scalar_lea.vmem [#allocation6], %s830_s5 }
  0x51   : > { %1136 = dma.done.wait (%p1912_p5), %s205_s29, 2048  }
  0x52   : > { %1138 = vsyncadd (%p1912_p5), %s205_s29, 4294965248  ;;  %s231_s18 = sand.u32 1, %s1150_s10   ;;  %s845_s20 = sshll.u32 %s1166_s14, 14  ;;  %v1180_v0 = vmov 0.0   ;;  %v1355_v1 = vld [vmem:[%s1334_s7] sm:$0xff]  ;;  %v1358_v2 = vld [vmem:[%s1334_s7 + $0x8] sm:$0xff] }
  0x53   : > { %s1350_s27 = sshll.u32 %s231_s18, 3  ;;  %247 = vst [vmem:[#allocation2] sm:$0xff] %v1180_v0  ;;  %248 = vst [vmem:[#allocation2 + $0x8] sm:$0xff] %v1180_v0  ;;  %s1352_s21 = sadd.s32 16384, %s845_s20  ;;  %v1361_v3 = vld [vmem:[%s1334_s7 + $0x10] sm:$0xff]  ;;  %v1364_v4 = vld [vmem:[%s1334_s7 + $0x18] sm:$0xff] }
  0x54   : > { %249 = vst [vmem:[#allocation2 + $0x10] sm:$0xff] %v1180_v0  ;;  %250 = vst [vmem:[#allocation2 + $0x18] sm:$0xff] %v1180_v0  ;;  %v1367_v5 = vld [vmem:[%s1334_s7 + $0x20] sm:$0xff]  ;;  %v1370_v6 = vld [vmem:[%s1334_s7 + $0x28] sm:$0xff]  ;;  %v283_v8 = vmax.f32 %v1355_v1, 0.0  ;;  %v284_v9 = vmax.f32 %v1358_v2, 0.0 }
  0x55   : > { %v1373_v7 = vld [vmem:[%s1334_s7 + $0x30] sm:$0xff]  ;;  %v285_v10 = vmax.f32 %v1361_v3, 0.0  ;;  %v1379_v11 = vld [vmem:[%s1334_s7 + $0x38] sm:$0xff]  ;;  %v1382_v12 = vld [vmem:[%s1334_s7 + $0x40] sm:$0xff]  ;;  %v286_v14 = vmax.f32 %v1364_v4, 0.0  ;;  %v287_v15 = vmax.f32 %v1367_v5, 0.0 }
  0x56   : > { %v1385_v13 = vld [vmem:[%s1334_s7 + $0x48] sm:$0xff]  ;;  %v288_v16 = vmax.f32 %v1370_v6, 0.0  ;;  %v1391_v17 = vld [vmem:[%s1334_s7 + $0x50] sm:$0xff]  ;;  %v1394_v18 = vld [vmem:[%s1334_s7 + $0x58] sm:$0xff]  ;;  %v289_v20 = vmax.f32 %v1373_v7, 0.0  ;;  %v290_v21 = vmax.f32 %v1379_v11, 0.0 }
  0x57   : > { %v1397_v19 = vld [vmem:[%s1334_s7 + $0x60] sm:$0xff]  ;;  %v291_v22 = vmax.f32 %v1382_v12, 0.0  ;;  %v1403_v23 = vld [vmem:[%s1334_s7 + $0x68] sm:$0xff]  ;;  %v1406_v24 = vld [vmem:[%s1334_s7 + $0x70] sm:$0xff]  ;;  %v292_v27 = vmax.f32 %v1385_v13, 0.0  ;;  %v293_v28 = vmax.f32 %v1391_v17, 0.0 }
  0x58   : > { %v1409_v25 = vld [vmem:[%s1334_s7 + $0x78] sm:$0xff]  ;;  %v267_v26 = vld [vmem:[%s1340_s8] sm:$0xff]  ;;  %v294_v29 = vmax.f32 %v1394_v18, 0.0  ;;  %v268_v30 = vld [vmem:[%s1340_s8 + $0x8] sm:$0xff]  ;;  %v331_v32 = vand.u32 2147483647, %v1355_v1 }
  0x59   : > { %v269_v31 = vld [vmem:[%s1340_s8 + $0x10] sm:$0xff]  ;;  %v332_v33 = vand.u32 2147483647, %v1358_v2  ;;  %v270_v34 = vld [vmem:[%s1340_s8 + $0x18] sm:$0xff]  ;;  %v295_v35 = vmax.f32 %v1397_v19, 0.0  ;;  %v271_v38 = vld [vmem:[%s1340_s8 + $0x20] sm:$0xff]  ;;  %v299_v44 = vmul.f32 %v267_v26, %v1355_v1  ;;  %v1431_v45 = vmul.f32 %v268_v30, %v1358_v2 }
  0x5a   : > { %v333_v36 = vand.u32 2147483647, %v1361_v3  ;;  %v334_v37 = vand.u32 2147483647, %v1364_v4  ;;  %v335_v42 = vand.u32 2147483647, %v1367_v5  ;;  %v1434_v46 = vmul.f32 %v269_v31, %v1361_v3 }
  0x5b   : > { %v272_v43 = vld [vmem:[%s1340_s8 + $0x28] sm:$0xff]  ;;  %v336_v47 = vand.u32 2147483647, %v1370_v6  ;;  %v273_v48 = vld [vmem:[%s1340_s8 + $0x30] sm:$0xff]  ;;  %v1439_v49 = vmul.f32 %v270_v34, %v1364_v4  ;;  %v337_v50 = vand.u32 2147483647, %v1373_v7  ;;  %v1444_v54 = vmul.f32 %v271_v38, %v1367_v5 }
  0x5c   : > { %v347_v51 = vsub.f32 0.0, %v331_v32  ;;  %v348_v52 = vsub.f32 0.0, %v332_v33  ;;  %v274_v53 = vld [vmem:[%s1340_s8 + $0x38] sm:$0xff]  ;;  %v338_v55 = vand.u32 2147483647, %v1379_v11  ;;  %v349_v56 = vsub.f32 0.0, %v333_v36 }
  0x5d   : > { %v350_v57 = vsub.f32 0.0, %v334_v37  ;;  %v1448_v58 = vmul.f32 %v272_v43, %v1370_v6  ;;  %v339_v59 = vand.u32 2147483647, %v1382_v12  ;;  %v340_v60 = vand.u32 2147483647, %v1385_v13  ;;  %s233_s3 = scalar_lea.vmem [#allocation8], %s1350_s27 }
  0x5e   : > { %v351_v61 = vsub.f32 0.0, %v335_v42  ;;  %v1453_v62 = vmul.f32 %v273_v48, %v1373_v7  ;;  %v341_v63 = vand.u32 2147483647, %v1391_v17  ;;  %v342_v0 = vand.u32 2147483647, %v1394_v18  ;;  %v275_v48 = vld [vmem:[%s1340_s8 + $0x40] sm:$0xff] }
  0x5f   : > { %v352_v1 = vsub.f32 0.0, %v336_v47  ;;  %v1458_v26 = vmul.f32 %v274_v53, %v1379_v11  ;;  %v353_v30 = vsub.f32 0.0, %v337_v50  ;;  %v363_v31 = vmul.f32 1.442695, %v347_v51  ;;  %v276_v51 = vld [vmem:[%s1340_s8 + $0x48] sm:$0xff]  ;;  %p834_p2 = scmp.gt.s32.totalorder %s1352_s21, 256 }
  0x60   : > { %v365_v32 = vmul.f32 1.442695, %v348_v52  ;;  %v1460_v33 = vsub.f32 %v283_v8, %v299_v44  ;;  %v354_v34 = vsub.f32 0.0, %v338_v55  ;;  %v367_v36 = vmul.f32 1.442695, %v349_v56  ;;  %v277_v55 = vld [vmem:[%s1340_s8 + $0x50] sm:$0xff] }
  0x61   : > { %v369_v37 = vmul.f32 1.442695, %v350_v57  ;;  %v343_v38 = vand.u32 2147483647, %v1397_v19  ;;  %v355_v42 = vsub.f32 0.0, %v339_v59  ;;  %943 = vpow2.f32 %v363_v31  ;;  %v278_v31 = vld [vmem:[%s1340_s8 + $0x58] sm:$0xff] }
  0x62   : > { %v371_v43 = vmul.f32 1.442695, %v351_v61  ;;  %v344_v47 = vand.u32 2147483647, %v1403_v23  ;;  %v356_v53 = vsub.f32 0.0, %v340_v60  ;;  %945 = vpow2.f32 %v365_v32  ;;  %v279_v32 = vld [vmem:[%s1340_s8 + $0x60] sm:$0xff] }
  0x63   : > { %v373_v50 = vmul.f32 1.442695, %v352_v1  ;;  %v345_v8 = vand.u32 2147483647, %v1406_v24  ;;  %v357_v44 = vsub.f32 0.0, %v341_v63  ;;  %947 = vpow2.f32 %v367_v36  ;;  %v280_v36 = vld [vmem:[%s1340_s8 + $0x68] sm:$0xff] }
  0x64   : > { %v375_v52 = vmul.f32 1.442695, %v353_v30  ;;  %v346_v56 = vand.u32 2147483647, %v1409_v25  ;;  %v358_v57 = vsub.f32 0.0, %v342_v0  ;;  %949 = vpow2.f32 %v369_v37 }
  0x65   : > { %v377_v59 = vmul.f32 1.442695, %v354_v34  ;;  %v307_v60 = vmul.f32 %v275_v48, %v1382_v12  ;;  %v359_v61 = vsub.f32 0.0, %v343_v38  ;;  %951 = vpow2.f32 %v371_v43  ;;  %v281_v34 = vld [vmem:[%s1340_s8 + $0x70] sm:$0xff] }
  0x66   : > { %v379_v1 = vmul.f32 1.442695, %v355_v42  ;;  %v308_v41 = vmul.f32 %v276_v51, %v1385_v13  ;;  %v360_v63 = vsub.f32 0.0, %v344_v47  ;;  %953 = vpow2.f32 %v373_v50 }
  0x67   : > { %v381_v30 = vmul.f32 1.442695, %v356_v53  ;;  %v309_v40 = vmul.f32 %v277_v55, %v1391_v17  ;;  %v361_v39 = vsub.f32 0.0, %v345_v8  ;;  %955 = vpow2.f32 %v375_v52 }
  0x68   : > { %v383_v0 = vmul.f32 1.442695, %v357_v44  ;;  %v1479_v37 = vsub.f32 %v284_v9, %v1431_v45  ;;  %v362_v38 = vsub.f32 0.0, %v346_v56  ;;  %957 = vpow2.f32 %v377_v59 }
  0x69   : > { %v385_v42 = vmul.f32 1.442695, %v358_v57  ;;  %v310_v43 = vmul.f32 %v278_v31, %v1394_v18  ;;  %v311_v48 = vmul.f32 %v279_v32, %v1397_v19  ;;  %959 = vpow2.f32 %v379_v1 }
  0x6a   : > { %v387_v47 = vmul.f32 1.442695, %v359_v61  ;;  %v312_v53 = vmul.f32 %v280_v36, %v1403_v23  ;;  %v1487_v50 = vsub.f32 %v285_v10, %v1434_v46  ;;  %961 = vpow2.f32 %v381_v30 }
  0x6b   : > { %v389_v2 = vmul.f32 1.442695, %v360_v63  ;;  %v944_v9 = vpop.eup %943  ;;  %v1490_v45 = vmul.f32 %v281_v34, %v1406_v24  ;;  %v1495_v51 = vsub.f32 %v286_v14, %v1439_v49  ;;  %963 = vpow2.f32 %v383_v0 }
  0x6c   : > { %v391_v8 = vmul.f32 1.442695, %v361_v39  ;;  %v946_v44 = vpop.eup %945  ;;  %v1500_v3 = vsub.f32 %v287_v15, %v1444_v54  ;;  %v1505_v10 = vsub.f32 %v288_v16, %v1448_v58  ;;  %965 = vpow2.f32 %v385_v42 }
  0x6d   : > { %v393_v46 = vmul.f32 1.442695, %v362_v38  ;;  %v1507_v52 = vpop.eup %947  ;;  %v1512_v4 = vsub.f32 %v289_v20, %v1453_v62  ;;  %v1517_v5 = vsub.f32 %v290_v21, %v1458_v26  ;;  %967 = vpow2.f32 %v387_v47 }
  0x6e   : > { %v395_v14 = vadd.f32 1.0, %v944_v9  ;;  %v1519_v15 = vpop.eup %949  ;;  %969 = vpow2.f32 %v389_v2  ;;  %v398_v6 = vmul.f32 -0.5, %v944_v9  ;;  %v404_v16 = vadd.f32 1.0, %v946_v44 }
  0x6f   : > { %v407_v39 = vmul.f32 -0.5, %v946_v44  ;;  %v1521_v49 = vpop.eup %951  ;;  %v1525_v7 = vsub.f32 %v291_v22, %v307_v60  ;;  %v1529_v20 = vsub.f32 %v292_v27, %v308_v41  ;;  %971 = vpow2.f32 %v391_v8 }
  0x70   : > { %v413_v11 = vadd.f32 1.0, %v1507_v52  ;;  %v1532_v21 = vpop.eup %953  ;;  %v1536_v54 = vsub.f32 %v293_v28, %v309_v40  ;;  %v1540_v58 = vsub.f32 %v294_v29, %v310_v43  ;;  %973 = vpow2.f32 %v393_v46 }
  0x71   : > { %v422_v12 = vadd.f32 1.0, %v1519_v15  ;;  %v1543_v22 = vpop.eup %955  ;;  %975 = vlog2.f32 %v395_v14  ;;  %v401_v13 = vand.u32 2147483647, %v944_v9  ;;  %v410_v27 = vand.u32 2147483647, %v946_v44 }
  0x72   : > { %v416_v41 = vmul.f32 -0.5, %v1507_v52  ;;  %v1546_v62 = vpop.eup %957  ;;  %v399_v26 = vadd.f32 1.0, %v398_v6  ;;  %977 = vlog2.f32 %v404_v16  ;;  %v408_v17 = vadd.f32 1.0, %v407_v39 }
  0x73   : > { %v431_v28 = vadd.f32 1.0, %v1521_v49  ;;  %v1549_v18 = vpop.eup %959  ;;  %979 = vlog2.f32 %v413_v11  ;;  %v419_v29 = vand.u32 2147483647, %v1507_v52  ;;  %v425_v40 = vmul.f32 -0.5, %v1519_v15 }
  0x74   : > { %v434_v55 = vmul.f32 -0.5, %v1521_v49  ;;  %v1554_v56 = vpop.eup %961  ;;  %v1558_v57 = vsub.f32 %v295_v35, %v311_v48  ;;  %v1913_v59 = vmax.f32 %v1403_v23, 0.0  ;;  %981 = vlog2.f32 %v422_v12 }
  0x75   : > { %v440_v61 = vadd.f32 1.0, %v1532_v21  ;;  %v1565_v1 = vpop.eup %963  ;;  %v417_v31 = vadd.f32 1.0, %v416_v41  ;;  %v428_v32 = vand.u32 2147483647, %v1519_v15  ;;  %983 = vlog2.f32 %v431_v28 }
  0x76   : > { %v1562_v60 = vsub.f32 %v1913_v59, %v312_v53  ;;  %v443_v63 = vmul.f32 -0.5, %v1532_v21  ;;  %v1569_v30 = vpop.eup %965  ;;  %v1571_v19 = vmul.f32 %v944_v9, %v399_v26  ;;  %vm1573_vm0 = vcmp.lt.f32.partialorder %v401_v13, 0.0004427343 }
  0x77   : > { %v1577_v23 = vmul.f32 %v946_v44, %v408_v17  ;;  %985 = vlog2.f32 %v440_v61  ;;  %v449_v36 = vadd.f32 1.0, %v1543_v22  ;;  %v1580_v0 = vpop.eup %967  ;;  %vm1582_vm1 = vcmp.lt.f32.partialorder %v410_v27, 0.0004427343 }
  0x78   : > { %vm1586_vm2 = vcmp.lt.f32.partialorder %v419_v29, 0.0004427343  ;;  %v426_v42 = vadd.f32 1.0, %v425_v40  ;;  %v435_v43 = vadd.f32 1.0, %v434_v55  ;;  %v452_v48 = vmul.f32 -0.5, %v1543_v22  ;;  %v1591_v47 = vpop.eup %969 }
  0x79   : > { %v437_v53 = vand.u32 2147483647, %v1521_v49  ;;  %987 = vlog2.f32 %v449_v36  ;;  %v458_v2 = vadd.f32 1.0, %v1546_v62  ;;  %v461_v9 = vmul.f32 -0.5, %v1546_v62  ;;  %v1596_v8 = vpop.eup %971 }
  0x7a   : > { %v1599_v44 = vmul.f32 %v1507_v52, %v417_v31  ;;  %vm1601_vm3 = vcmp.lt.f32.partialorder %v428_v32, 0.0004427343  ;;  %v444_v14 = vadd.f32 1.0, %v443_v63  ;;  %v446_v6 = vand.u32 2147483647, %v1532_v21  ;;  %v1606_v16 = vpop.eup %973 }
  0x7b   : > { %v455_v39 = vand.u32 2147483647, %v1543_v22  ;;  %989 = vlog2.f32 %v458_v2  ;;  %v467_v11 = vadd.f32 1.0, %v1549_v18  ;;  %v470_v12 = vmul.f32 -0.5, %v1549_v18  ;;  %v976_v13 = vpop.eup %975 }
  0x7c   : > { %v1612_v52 = vmul.f32 %v1519_v15, %v426_v42  ;;  %v1615_v27 = vmul.f32 %v1521_v49, %v435_v43  ;;  %v453_v41 = vadd.f32 1.0, %v452_v48  ;;  %v476_v26 = vadd.f32 1.0, %v1554_v56  ;;  %v978_v17 = vpop.eup %977 }
  0x7d   : > { %vm1618_vm4 = vcmp.lt.f32.partialorder %v437_v53, 0.0004427343  ;;  %v462_v29 = vadd.f32 1.0, %v461_v9  ;;  %v464_v40 = vand.u32 2147483647, %v1546_v62  ;;  %991 = vlog2.f32 %v467_v11  ;;  %v980_v59 = vpop.eup %979 }
  0x7e   : > { %v473_v55 = vand.u32 2147483647, %v1549_v18  ;;  %v1624_v15 = vmul.f32 0.6931472, %v976_v13  ;;  %vm1626_vm5 = vcmp.lt.f32.partialorder %v446_v6, 0.0004427343  ;;  %993 = vlog2.f32 %v476_v26  ;;  %v982_v32 = vpop.eup %981 }
  0x7f   : > { %v471_v61 = vadd.f32 1.0, %v470_v12  ;;  %v479_v31 = vmul.f32 -0.5, %v1554_v56  ;;  %v1631_v63 = vmul.f32 0.6931472, %v978_v17  ;;  %v1633_v36 = vmul.f32 0.6931472, %v980_v59  ;;  %v984_v48 = vpop.eup %983 }
  0x80   : > { %v1636_v42 = vmul.f32 %v1532_v21, %v444_v14  ;;  %vm1638_vm6 = vcmp.lt.f32.partialorder %v455_v39, 0.0004427343  ;;  %v1642_v53 = vmul.f32 0.6931472, %v982_v32  ;;  %v1645_v2 = vmul.f32 %v1543_v22, %v453_v41 }
  0x81   : > { %v482_v9 = vand.u32 2147483647, %v1554_v56  ;;  %v485_v6 = vadd.f32 1.0, %v1565_v1  ;;  %v986_v11 = vpop.eup %985  ;;  %v1650_v12 = vmul.f32 %v1546_v62, %v462_v29  ;;  %vm1652_vm7 = vcmp.lt.f32.partialorder %v464_v40, 0.0004427343 }
  0x82   : > { %vm1656_vm8 = vcmp.lt.f32.partialorder %v473_v55, 0.0004427343  ;;  %v488_v39 = vmul.f32 -0.5, %v1565_v1  ;;  %v403_v22 = vsel %vm1573_vm0, %v1571_v19, %v1624_v15  ;;  %v1666_v13 = vmul.f32 %v1549_v18, %v471_v61 }
  0x83   : > { %v480_v62 = vadd.f32 1.0, %v479_v31  ;;  %995 = vlog2.f32 %v485_v6  ;;  %v988_v41 = vpop.eup %987  ;;  %v412_v26 = vsel %vm1582_vm1, %v1577_v23, %v1631_v63  ;;  %v421_v17 = vsel %vm1586_vm2, %v1599_v44, %v1633_v36 }
  0x84   : > { %v433_v29 = vmul.f32 0.6931472, %v984_v48  ;;  %v494_v35 = vadd.f32 1.0, %v1569_v30  ;;  %v430_v18 = vsel %vm1601_vm3, %v1612_v52, %v1642_v53  ;;  %v442_v19 = vmul.f32 0.6931472, %v986_v11 }
  0x85   : > { %vm1681_vm9 = vcmp.lt.f32.partialorder %v482_v9, 0.0004427343  ;;  %v497_v23 = vmul.f32 -0.5, %v1569_v30  ;;  %v990_v34 = vpop.eup %989  ;;  %v489_v55 = vadd.f32 1.0, %v488_v39  ;;  %v491_v38 = vand.u32 2147483647, %v1565_v1 }
  0x86   : > { %997 = vlog2.f32 %v494_v35  ;;  %v503_v44 = vadd.f32 1.0, %v1580_v0  ;;  %v451_v59 = vmul.f32 0.6931472, %v988_v41  ;;  %v460_v15 = vmul.f32 0.6931472, %v990_v34  ;;  %v563_v35 = vld [vmem:[#allocation2 + $0x10] sm:$0xff] (!%p834_p2) }
  0x87   : > { %v481_v61 = vmul.f32 %v1554_v56, %v480_v62  ;;  %v500_v46 = vand.u32 2147483647, %v1569_v30  ;;  %v992_v52 = vpop.eup %991  ;;  %v498_v31 = vadd.f32 1.0, %v497_v23  ;;  %v506_v32 = vmul.f32 -0.5, %v1580_v0 }
  0x88   : > { %999 = vlog2.f32 %v503_v44  ;;  %v512_v63 = vadd.f32 1.0, %v1591_v47  ;;  %v994_v36 = vpop.eup %993  ;;  %v439_v48 = vsel %vm1618_vm4, %v1615_v27, %v433_v29  ;;  %v469_v53 = vmul.f32 0.6931472, %v992_v52 }
  0x89   : > { %v509_v9 = vand.u32 2147483647, %v1580_v0  ;;  %v515_v6 = vmul.f32 -0.5, %v1591_v47  ;;  %v448_v56 = vsel %vm1626_vm5, %v1636_v42, %v442_v19  ;;  %v478_v11 = vmul.f32 0.6931472, %v994_v36 }
  0x8a   : > { %v490_v39 = vmul.f32 %v1565_v1, %v489_v55  ;;  %1001 = vlog2.f32 %v512_v63  ;;  %v457_v62 = vsel %vm1638_vm6, %v1645_v2, %v451_v59  ;;  %vm1704_vm10 = vcmp.lt.f32.partialorder %v491_v38, 0.0004427343 }
  0x8b   : > { %v507_v27 = vadd.f32 1.0, %v506_v32  ;;  %v521_v41 = vadd.f32 1.0, %v1596_v8  ;;  %v466_v49 = vsel %vm1652_vm7, %v1650_v12, %v460_v15  ;;  %v499_v42 = vmul.f32 %v1569_v30, %v498_v31 }
  0x8c   : > { %vm1713_vm11 = vcmp.lt.f32.partialorder %v500_v46, 0.0004427343  ;;  %v516_v29 = vadd.f32 1.0, %v515_v6  ;;  %v475_v2 = vsel %vm1656_vm8, %v1666_v13, %v469_v53  ;;  %vm1720_vm12 = vcmp.lt.f32.partialorder %v509_v9, 0.0004427343 }
  0x8d   : > { %v996_v43 = vpop.eup %995  ;;  %1003 = vlog2.f32 %v521_v41  ;;  %v530_v21 = vadd.f32 1.0, %v1606_v16  ;;  %v484_v30 = vsel %vm1681_vm9, %v481_v61, %v478_v11  ;;  %v518_v19 = vand.u32 2147483647, %v1591_v47 }
  0x8e   : > { %v487_v12 = vmul.f32 0.6931472, %v996_v43  ;;  %v524_v23 = vmul.f32 -0.5, %v1596_v8  ;;  %v508_v34 = vmul.f32 %v1580_v0, %v507_v27  ;;  %v1731_v14 = vadd.f32 %v403_v22, %v1460_v33 }
  0x8f   : > { %1005 = vlog2.f32 %v530_v21  ;;  %v1734_v13 = vadd.f32 %v412_v26, %v1479_v37  ;;  %v517_v38 = vmul.f32 %v1591_v47, %v516_v29  ;;  %v527_v40 = vand.u32 2147483647, %v1596_v8  ;;  %v282_v26 = vld [vmem:[%s1340_s8 + $0x78] sm:$0xff] }
  0x90   : > { %v998_v55 = vpop.eup %997  ;;  %v533_v44 = vmul.f32 -0.5, %v1606_v16  ;;  %v1740_v59 = vadd.f32 %v421_v17, %v1487_v50  ;;  %v493_v0 = vsel %vm1704_vm10, %v490_v39, %v487_v12  ;;  %v1745_v33 = vadd.f32 %v430_v18, %v1495_v51  ;;  %v564_v21 = vld [vmem:[#allocation2 + $0x18] sm:$0xff] (!%p834_p2) }
  0x91   : > { %v496_v15 = vmul.f32 0.6931472, %v998_v55  ;;  %v1748_v37 = vadd.f32 %v439_v48, %v1500_v3  ;;  %v525_v47 = vadd.f32 1.0, %v524_v23  ;;  %v1752_v61 = vadd.f32 %v448_v56, %v1505_v10 }
  0x92   : > { %v1000_v22 = vpop.eup %999  ;;  %v1755_v46 = vadd.f32 %v457_v62, %v1512_v4  ;;  %v1758_v50 = vadd.f32 %v466_v49, %v1517_v5  ;;  %v1763_v18 = vadd.f32 %v475_v2, %v1525_v7  ;;  %v1766_v3 = vadd.f32 %v484_v30, %v1529_v20  ;;  %v561_v49 = vld [vmem:[#allocation2] sm:$0xff] (!%p834_p2)  ;;  %v562_v2 = vld [vmem:[#allocation2 + $0x8] sm:$0xff] (!%p834_p2) }
  0x93   : > { %v502_v17 = vsel %vm1713_vm11, %v499_v42, %v496_v15  ;;  %v505_v51 = vmul.f32 0.6931472, %v1000_v22  ;;  %vm1768_vm13 = vcmp.lt.f32.partialorder %v518_v19, 0.0004427343  ;;  %v534_v4 = vadd.f32 1.0, %v533_v44 }
  0x94   : > { %v1002_v52 = vpop.eup %1001  ;;  %v1773_v31 = vadd.f32 %v493_v0, %v1536_v54  ;;  %v1776_v5 = vadd.f32 %v502_v17, %v1540_v58  ;;  %v314_v32 = vmul.f32 %v282_v26, %v1409_v25  ;;  %v536_v20 = vand.u32 2147483647, %v1606_v16 }
  0x95   : > { %v511_v7 = vsel %vm1720_vm12, %v508_v34, %v505_v51  ;;  %v514_v63 = vmul.f32 0.6931472, %v1002_v52  ;;  %v526_v36 = vmul.f32 %v1596_v8, %v525_v47  ;;  %v1942_v54 = vmax.f32 %v1406_v24, 0.0 }
  0x96   : > { %v1784_v48 = vadd.f32 %v511_v7, %v1558_v57  ;;  %vm528_vm14 = vcmp.lt.f32.partialorder %v527_v40, 0.0004427343  ;;  %v535_v56 = vmul.f32 %v1606_v16, %v534_v4  ;;  %v1943_v57 = vmax.f32 %v1409_v25, 0.0 }
  0x97   : > { %v1004_v53 = vpop.eup %1003  ;;  %v329_v58 = vsub.f32 %v1942_v54, %v1490_v45  ;;  %v520_v9 = vsel %vm1768_vm13, %v517_v38, %v514_v63  ;;  %vm537_vm15 = vcmp.lt.f32.partialorder %v536_v20, 0.0004427343  ;;  %560 = sbr.rel (%p834_p2) target bundleno = 164 (0xa4), region = 44  ;;  %v568_v16 = vadd.f32 (!%p834_p2), %v1752_v61, %v1734_v13 }
  0x98   : > { %v523_v6 = vmul.f32 0.6931472, %v1004_v53  ;;  %v1793_v11 = vadd.f32 %v520_v9, %v1562_v60  ;;  %v330_v39 = vsub.f32 %v1943_v57, %v314_v32  ;;  %v565_v60 = vadd.f32 (!%p834_p2), %v1748_v37, %v1731_v14 }
  0x99   : > { %v1006_v8 = vpop.eup %1005  ;;  %v571_v25 = vadd.f32 (!%p834_p2), %v1755_v46, %v1740_v59  ;;  %v574_v41 = vadd.f32 (!%p834_p2), %v1758_v50, %v1745_v33  ;;  %v569_v1 = vadd.f32 (!%p834_p2), %v568_v16, %v1766_v3 }
  0x9a   : > { %v529_v62 = vsel %vm528_vm14, %v526_v36, %v523_v6  ;;  %v532_v28 = vmul.f32 0.6931472, %v1006_v8  ;;  %v566_v42 = vadd.f32 (!%p834_p2), %v565_v60, %v1763_v18 }
  0x9b   : > { %v1797_v27 = vadd.f32 %v529_v62, %v329_v58  ;;  %v572_v29 = vadd.f32 (!%p834_p2), %v571_v25, %v1773_v31  ;;  %v575_v43 = vadd.f32 (!%p834_p2), %v574_v41, %v1776_v5  ;;  %v570_v12 = vadd.f32 (!%p834_p2), %v569_v1, %v1793_v11 }
  0x9c   : > { %v538_v24 = vsel %vm537_vm15, %v535_v56, %v532_v28  ;;  %v567_v30 = vadd.f32 (!%p834_p2), %v566_v42, %v1784_v48 }
  0x9d   : > { %v1799_v45 = vadd.f32 %v538_v24, %v330_v39  ;;  %v573_v19 = vadd.f32 (!%p834_p2), %v572_v29, %v1797_v27  ;;  %v578_v55 = vadd.f32 (!%p834_p2), %v570_v12, %v562_v2 }
  0x9e   : > { %v577_v34 = vadd.f32 %v567_v30, %v561_v49 }
  0x9f   : > { %v576_v23 = vadd.f32 %v575_v43, %v1799_v45  ;;  %v579_v38 = vadd.f32 %v573_v19, %v563_v35  ;;  %582 = vst [vmem:[#allocation2 + $0x8] sm:$0xff] %v578_v55 }
  0xa0   : > { %581 = vst [vmem:[#allocation2] sm:$0xff] %v577_v34 }
  0xa1   : > { %v580_v40 = vadd.f32 %v576_v23, %v564_v21  ;;  %583 = vst [vmem:[#allocation2 + $0x10] sm:$0xff] %v579_v38 }
  0xa3   : > { %584 = vst [vmem:[#allocation2 + $0x18] sm:$0xff] %v580_v40 }
  0xa4 PF: > { %p835_p8 = scmp.le.s32.totalorder %s1352_s21, 256 }
  0xa5   : > { %v589_v44 = vlaneseq (!%p835_p8)  ;;  %s836_s28 = sshll.u32 (!%p835_p8), %s1166_s14, 5 }
  0xa6   : > { %588 = sbr.rel (%p835_p8) target bundleno = 197 (0xc5), region = 48  ;;  %v595_v0 = vstv (!%p835_p8), %s836_s28 }
  0xa7   : > { %v590_v15 = vshrl.u32 (!%p835_p8), %v589_v44, 7  ;;  %v601_v22 = vand.u32 (!%p835_p8), 127, %v589_v44  ;;  %v657_v30 = vld [vmem:[#allocation2] sm:$0xff] (!%p835_p8) }
  0xa9   : > { %v591_v26 = vadd.s32 (!%p835_p8), 8, %v590_v15  ;;  %v592_v47 = vadd.s32 (!%p835_p8), 16, %v590_v15  ;;  %v593_v17 = vadd.s32 (!%p835_p8), 24, %v590_v15  ;;  %v596_v51 = vadd.s32 (!%p835_p8), %v595_v0, %v590_v15 }
  0xaa   : > { %v602_v52 = vadd.s32 (!%p835_p8), 128, %v601_v22  ;;  %v603_v10 = vadd.s32 (!%p835_p8), 256, %v601_v22  ;;  %v604_v4 = vadd.s32 (!%p835_p8), 384, %v601_v22 }
  0xab   : > { %v597_v32 = vadd.s32 (!%p835_p8), %v595_v0, %v591_v26  ;;  %v598_v7 = vadd.s32 (!%p835_p8), %v595_v0, %v592_v47  ;;  %v599_v63 = vadd.s32 (!%p835_p8), %v595_v0, %v593_v17  ;;  %v605_v20 = vmul.u32 (!%p835_p8), 512, %v596_v51  ;;  %v660_v51 = vld [vmem:[#allocation2 + $0x18] sm:$0xff] (!%p835_p8) }
  0xad   : > { %v606_v36 = vmul.u32 512, %v597_v32  ;;  %v607_v53 = vmul.u32 512, %v598_v7  ;;  %v609_v54 = vadd.s32 %v605_v20, %v601_v22  ;;  %v610_v58 = vadd.s32 %v605_v20, %v602_v52 }
  0xae   : > { %v608_v9 = vmul.u32 512, %v599_v63  ;;  %v611_v6 = vadd.s32 %v605_v20, %v603_v10  ;;  %v612_v56 = vadd.s32 %v605_v20, %v604_v4 }
  0xaf   : > { %v613_v8 = vadd.s32 %v606_v36, %v601_v22  ;;  %v617_v57 = vadd.s32 %v607_v53, %v601_v22  ;;  %vm625_vm0 = vcmp.lt.s32.totalorder %v609_v54, 256  ;;  %v614_v39 = vadd.s32 %v606_v36, %v602_v52 }
  0xb0   : > { %v621_v62 = vadd.s32 %v608_v9, %v601_v22  ;;  %v641_v28 = vsel %vm625_vm0, %v1731_v14, 0.0  ;;  %v618_v24 = vadd.s32 %v607_v53, %v602_v52  ;;  %v622_v60 = vadd.s32 %v608_v9, %v602_v52 }
  0xb1   : > { %vm629_vm1 = vcmp.lt.s32.totalorder %v613_v8, 256  ;;  %vm633_vm2 = vcmp.lt.s32.totalorder %v617_v57, 256  ;;  %vm626_vm3 = vcmp.lt.s32.totalorder %v610_v58, 256  ;;  %vm630_vm4 = vcmp.lt.s32.totalorder %v614_v39, 256 }
  0xb2   : > { %vm637_vm5 = vcmp.lt.s32.totalorder %v621_v62, 256  ;;  %v645_v16 = vsel %vm629_vm1, %v1748_v37, 0.0  ;;  %v649_v25 = vsel %vm633_vm2, %v1763_v18, 0.0  ;;  %vm634_vm6 = vcmp.lt.s32.totalorder %v618_v24, 256 }
  0xb3   : > { %v653_v41 = vsel %vm637_vm5, %v1784_v48, 0.0  ;;  %v661_v49 = vadd.f32 %v645_v16, %v641_v28  ;;  %vm638_vm7 = vcmp.lt.s32.totalorder %v622_v60, 256  ;;  %v642_v42 = vsel %vm626_vm3, %v1734_v13, 0.0  ;;  %v658_v13 = vld [vmem:[#allocation2 + $0x8] sm:$0xff] }
  0xb4   : > { %v646_v14 = vsel %vm630_vm4, %v1752_v61, 0.0  ;;  %v650_v1 = vsel %vm634_vm6, %v1766_v3, 0.0  ;;  %v654_v29 = vsel %vm638_vm7, %v1793_v11, 0.0  ;;  %v615_v43 = vadd.s32 %v606_v36, %v603_v10 }
  0xb5   : > { %v662_v2 = vadd.f32 %v661_v49, %v649_v25  ;;  %v664_v35 = vadd.f32 %v646_v14, %v642_v42  ;;  %v619_v21 = vadd.s32 %v607_v53, %v603_v10  ;;  %v623_v37 = vadd.s32 %v608_v9, %v603_v10 }
  0xb6   : > { %vm627_vm8 = vcmp.lt.s32.totalorder %v611_v6, 256  ;;  %vm631_vm9 = vcmp.lt.s32.totalorder %v615_v43, 256  ;;  %v616_v18 = vadd.s32 %v606_v36, %v604_v4  ;;  %v620_v48 = vadd.s32 %v607_v53, %v604_v4 }
  0xb7   : > { %v663_v12 = vadd.f32 %v662_v2, %v653_v41  ;;  %v665_v19 = vadd.f32 %v664_v35, %v650_v1  ;;  %vm635_vm10 = vcmp.lt.s32.totalorder %v619_v21, 256  ;;  %vm639_vm11 = vcmp.lt.s32.totalorder %v623_v37, 256 }
  0xb8   : > { %v643_v61 = vsel %vm627_vm8, %v1740_v59, 0.0  ;;  %v647_v3 = vsel %vm631_vm9, %v1755_v46, 0.0  ;;  %v651_v11 = vsel %vm635_vm10, %v1773_v31, 0.0  ;;  %v624_v38 = vadd.s32 %v608_v9, %v604_v4  ;;  %v659_v59 = vld [vmem:[#allocation2 + $0x10] sm:$0xff] }
  0xb9   : > { %v673_v23 = vadd.f32 %v663_v12, %v657_v30  ;;  %v666_v34 = vadd.f32 %v665_v19, %v654_v29  ;;  %v667_v55 = vadd.f32 %v647_v3, %v643_v61  ;;  %v655_v40 = vsel %vm639_vm11, %v1797_v27, 0.0 }
  0xba   : > { %vm628_vm12 = vcmp.lt.s32.totalorder %v612_v56, 256  ;;  %vm632_vm13 = vcmp.lt.s32.totalorder %v616_v18, 256  ;;  %vm636_vm14 = vcmp.lt.s32.totalorder %v620_v48, 256  ;;  %vm640_vm15 = vcmp.lt.s32.totalorder %v624_v38, 256 }
  0xbb   : > { %677 = vst [vmem:[#allocation2] sm:$0xff] %v673_v23  ;;  %v674_v44 = vadd.f32 %v666_v34, %v658_v13  ;;  %v668_v0 = vadd.f32 %v667_v55, %v651_v11  ;;  %v644_v15 = vsel %vm628_vm12, %v1745_v33, 0.0  ;;  %v648_v46 = vsel %vm632_vm13, %v1758_v50, 0.0 }
  0xbc   : > { %v652_v31 = vsel %vm636_vm14, %v1776_v5, 0.0  ;;  %v670_v26 = vadd.f32 %v648_v46, %v644_v15  ;;  %v656_v47 = vsel %vm640_vm15, %v1799_v45, 0.0 }
  0xbd   : > { %678 = vst [vmem:[#allocation2 + $0x8] sm:$0xff] %v674_v44  ;;  %v669_v22 = vadd.f32 %v668_v0, %v655_v40 }
  0xbe   : > { %v671_v17 = vadd.f32 %v670_v26, %v652_v31 }
  0xbf   : > { %v675_v27 = vadd.f32 %v669_v22, %v659_v59 }
  0xc0   : > { %v672_v52 = vadd.f32 %v671_v17, %v656_v47 }
  0xc1   : > { %679 = vst [vmem:[#allocation2 + $0x10] sm:$0xff] %v675_v27 }
  0xc2   : > { %v676_v10 = vadd.f32 %v672_v52, %v660_v51 }
  0xc4   : > { %680 = vst [vmem:[#allocation2 + $0x18] sm:$0xff] %v676_v10 }
  0xc5 PF: > { %v684_v4 = vld [vmem:[#allocation2] sm:$0xff]  ;;  %v685_v33 = vld [vmem:[#allocation2 + $0x8] sm:$0xff]  ;;  %s838_s12 = sshll.u32 %s1166_s14, 7  ;;  %s716_s17 = sshll.u32 %s233_s3, 4  ;;  %s1845_s17 = int_to_ptr.vmem [resolvable:$true] %s716_s17 }
  0xc6   : > { %v688_v32 = vadd.f32 %v685_v33, %v684_v4  ;;  %s1843_s30 = scalar_lea.hbm %s1902_s2, %s838_s12  ;;  %s703_s5 = scalar_lea.sflag [#allocation5], %s231_s18 }
  0xc7   : > { %s1067_s6 = scalar_lea.vmem %s1845_s17, 128  ;;  %p1944_p10 = scmp.ne.s32.totalorder %s1907_s25, 0 }
  0xc8   : > { %v686_v50 = vld [vmem:[#allocation2 + $0x10] sm:$0xff]  ;;  %p1068_p9 = scmp.ne.s32.totalorder %s1845_s17, %s1067_s6  ;;  %s1181_s14 = smov [#allocation8]  }
  0xc9   : > { %v689_v7 = vadd.f32 %v688_v32, %v686_v50  ;;  %s1071_s7 = sshll.u32 %s1181_s14, 4  ;;  %s1072_s7 = int_to_ptr.vmem [resolvable:$false] %s1071_s7 }
  0xca   : > { %p1069_p11 = pnand %p1068_p9, %p1944_p10  ;;  %s1073_s29 = scalar_lea.vmem %s1072_s7, 256 }
  0xcb   : > { %v687_v5 = vld [vmem:[#allocation2 + $0x18] sm:$0xff]  ;;  %p1074_p3 = scmp.lt.s32.totalorder %s1845_s17, %s1072_s7  ;;  %p1075_p7 = scmp.lt.s32.totalorder %s1073_s29, %s1067_s6 }
  0xcc   : > { %v690_v63 = vadd.f32 %v689_v7, %v687_v5  ;;  %p1070_p1 = pneg %p1069_p11 }
  0xcd   : > { %p1076_p13 = por %p1075_p7, %p1074_p3 }
  0xce   : > { %691 = vadd.xlane.f32.xlu0 %v690_v63 }
  0xcf   : > { %p1077_p4 = pnand %p1076_p13, %p1070_p1 }
 0x15b   : > { %v692_v45 = vpop.xlane.xlu0 %691 }
 0x15c   : > { %v693_v20 = vrot.slane %v692_v45, 4 }
 0x15e   : > { %v694_v36 = vadd.f32 %v693_v20, %v692_v45 }
 0x160   : > { %v695_v53 = vrot.slane %v694_v36, 2 }
 0x162   : > { %v696_v54 = vadd.f32 %v695_v53, %v694_v36 }
 0x164   : > { %v697_v58 = vrot.slane %v696_v54, 1 }
 0x166   : > { %v698_v9 = vadd.f32 %v697_v58, %v696_v54 }
 0x168   : > { %847 = vpush %v698_v9 }
 0x199   : > { %s848_s4 = spop %847 }
 0x19a   : > { %v700_v6 = vstv %s848_s4 }
 0x19b   : > { %701 = vst [vmem:[%s233_s3] sm:$0xff] %v700_v6 }
 0x19c   : > { %1080 = shalt.err (!%p1077_p4)
}
 0x19d   : > { %s1081_s8 = scalar_lea.hbm %s1843_s30, 128  ;;  %s1085_s27 = scalar_lea.hbm %s1902_s2, 256 }
 0x19e   : > { %p1082_p6 = scmp.ne.s32.totalorder %s1843_s30, %s1081_s8  ;;  %p1086_p5 = scmp.lt.u32.totalorder %s1843_s30, %s1902_s2 }
 0x19f   : > { %p1087_p2 = scmp.lt.u32.totalorder %s1085_s27, %s1081_s8  ;;  %p1089_p9 = scmp.lt.u32.totalorder %s1081_s8, %s1843_s30 }
 0x1a0   : > { %p1083_p12 = pnand %p1082_p6, %p1944_p10 }
 0x1a1   : > { %p1088_p8 = por %p1087_p2, %p1086_p5 }
 0x1a2   : > { %p1084_p0 = pneg %p1083_p12 }
 0x1a3   : > { %p1090_p11 = por %p1089_p9, %p1088_p8 }
 0x1a5   : > { %p1091_p1 = pnand %p1090_p11, %p1084_p0 }
 0x1a7   : > { %1094 = shalt.err (!%p1091_p1)
}
 0x1a8   : > { %853 = dma.vmem_to_hbm [thread:$0]  (%p1944_p10), %s1845_s17, 128, %s1843_s30, %s703_s5  }
 0x1a9 PF: > { %s728_s28 = sand.u32 1, %s1146_s9   ;;  %p1945_p3 = scmp.ne.s32.totalorder %s1908_s26, 0 }
 0x1aa   : > { %p1946_p7 = scmp.ge.s32.totalorder %s1174_s16, 2  ;;  %s729_s12 = scalar_lea.sflag [#allocation5], %s728_s28 }
 0x1ac   : > { %p863_p13 = pnand %p1946_p7, %p1945_p3 }
 0x1ae   : > { %1140 = dma.done.wait (!%p863_p13), %s729_s12, 128  }
 0x1af   : > { %1142 = vsyncadd (!%p863_p13), %s729_s12, 4294967168  ;;  %s21_s16 = sadd.s32 1, %s1174_s16   ;;  %s1947_s9 = smov %s1150_s10 }
 0x1b0   : > { %p18_p4 = scmp.ge.s32.totalorder %s21_s16, 4   ;;  %s1948_s10 = smov %s1154_s11 }
 0x1b1   : > { %s1949_s11 = smov %s1255_s24  ;;  %s1950_s12 = smov %s1162_s13 }
 0x1b2   : > { %s1890_s13 = smov 0   ;;  %s1951_s14 = smov %s1170_s15 }
 0x1b3   : > { %s1952_s15 = smov %s1954_s19  ;;  %20 = sbr.rel (!%p18_p4) target bundleno = 9 (0x9), region = 102 }
 0x1ba   :  { %734 = vsyncpa [#allocation4], 1 }
 0x1bb   :  { %736 = vsyncpa [#allocation4 + $0x1], 1 }
 0x1bc   :  { %737 = vsyncpa [#allocation7], 1 }
 0x1bd   :  { %739 = vsyncpa [#allocation7 + $0x1], 1 }
 0x1be   :  { %740 = vsyncpa [#allocation5], 1 }
 0x1bf   :  { %742 = vsyncpa [#allocation5 + $0x1], 1 }

</bundles_post_ra>
